<compile_context>
chip_gen: v7x
topology: tpu7x:2x2x1
jax: 0.10.0
libtpu: 0.0.40
codegen_flags: <defaults>
</compile_context>

<pallas_src>
import functools

import jax
import jax.numpy as jnp
from jax.experimental import pallas as pl
from jax.experimental.pallas import tpu as pltpu

# Hard-concrete / L0 constants (module-level globals in the reference code).
LIMIT_A = -0.1
LIMIT_B = 1.1
EPSILON = 1e-6


# ---------------------------------------------------------------------------
# Stage 1: batch-invariant work (L0 mask, Chebyshev supports, per-node bias).
# Runs once per timestep; everything stays f32 (mask is checked at 1e-5).
# ---------------------------------------------------------------------------
def _mask_supports_bias_kernel(emb_ref, h_ref, eps_ref, qzw_ref, qzb_ref,
                               bw_ref, mask_ref, supp_ref, bzr_ref, bu_ref,
                               *, node_num, cheb_k, temperature, two_dout):
    f32 = jnp.float32
    N = node_num
    inv_t = 1.0 / temperature

    emb = emb_ref[...]                      # (N, De)
    eps = eps_ref[...]                      # (N, N)

    # --- L0 hard-concrete gate (qz_linear + sample_weights) ---
    qz_loga = jnp.dot(h_ref[...], qzw_ref[...],
                      preferred_element_type=f32) + qzb_ref[...]
    y = jax.nn.sigmoid((jnp.log(eps) - jnp.log(1.0 - eps) + qz_loga) * inv_t)
    mask = jnp.clip(y * (LIMIT_B - LIMIT_A) + LIMIT_A, 0.0, 1.0)
    mask_ref[...] = mask

    # --- adaptive supports gated by the L0 mask ---
    # TODO(synk): AVWGCNT source not provided; assumed standard AVWGCN supports
    # softmax(relu(E E^T), axis=-1) elementwise-gated by `mask`; `adj` unused.
    sim = jnp.dot(emb, emb.T, preferred_element_type=f32)
    supports = jax.nn.softmax(jnp.maximum(sim, 0.0), axis=-1) * mask

    # Chebyshev supports S_1..S_{K-1}; S_0 = I never enters a matmul (the
    # batched stage uses the raw features for k = 0).
    supp_ref[0] = supports
    if cheb_k >= 3:
        row = jax.lax.broadcasted_iota(jnp.int32, (N, N), 0)
        col = jax.lax.broadcasted_iota(jnp.int32, (N, N), 1)
        prev2 = (row == col).astype(f32)
        prev1 = supports
        for k in range(2, cheb_k):
            nxt = (2.0 * jnp.dot(supports, prev1, preferred_element_type=f32)
                   - prev2)
            supp_ref[k - 1] = nxt
            prev2, prev1 = prev1, nxt

    # Per-node biases for [z|r] and the candidate: ONE MXU push on N rows
    # (batch invariant), lane-split at 2*dim_out inside a single vreg span.
    bias = jnp.dot(emb, bw_ref[...], preferred_element_type=f32)   # (N, 3*Do)
    bzr_ref[...] = bias[:, :two_dout]
    bu_ref[...] = bias[:, two_dout:]


# ---------------------------------------------------------------------------
# Stage 2: batched gated graph-conv GRU over a parallel batch-tile grid.
# ---------------------------------------------------------------------------
def _agcrn_batch_kernel(xst_ref, sts_ref, supp_ref, wg_ref, wux_ref, wus_ref,
                        selg_ref, selu_ref, embg_ref, embu_ref,
                        bzr_ref, bu_ref,
                        hout_ref,
                        pxslab, pzslab, zslab, rslab,
                        *, b_tile, node_num, cheb_k, dim_out, mxu_dtype):
    f32 = jnp.float32
    N = node_num
    Do = dim_out
    c = mxu_dtype

    xst = xst_ref[...]          # (BT*N, cin)  x||state, MXU dtype
    sts = sts_ref[...]          # (BT*N, Do)   state, f32 (GRU combine)
    embg = embg_ref[...]        # (N, De*2Do)  f32, reused for every sub-block
    embu = embu_ref[...]        # (N, De*Do)
    bzr = bzr_ref[...]          # (N, 2Do)
    bu = bu_ref[...]            # (N, Do)

    # ---- k = 0: fused x||state gate contraction; candidate x-contribution
    #      via zero-padded (state rows = 0) update weights, no lane slicing ----
    tg = jnp.dot(xst, wg_ref[0], preferred_element_type=f32)      # (BT*N, De*2Do)
    tux = jnp.dot(xst, wux_ref[0], preferred_element_type=f32)    # (BT*N, De*Do)

    # ---- k >= 1: per-batch Chebyshev propagation into a VMEM slab (row
    #      offset b*N), then one wide contraction per support over all rows ----
    for k in range(1, cheb_k):
        s_k = supp_ref[k - 1]
        for b in range(b_tile):
            r0 = b * N
            p_b = jnp.dot(s_k, xst[r0:r0 + N, :], preferred_element_type=f32)
            pxslab[r0:r0 + N, :] = p_b.astype(c)
        px = pxslab[...]
        tg = tg + jnp.dot(px, wg_ref[k], preferred_element_type=f32)
        tux = tux + jnp.dot(px, wux_ref[k], preferred_element_type=f32)

    # ---- gate epilogue: per-node embedding weighting + merged z|r selection
    #      matmul + bias; the (N, .) tiles are reused for every batch block ----
    for b in range(b_tile):
        r0 = b * N
        ug = tg[r0:r0 + N, :] * embg
        zr = jax.nn.sigmoid(
            jnp.dot(ug.astype(c), selg_ref[...], preferred_element_type=f32)
            + bzr)
        z_b = zr[:, :Do]
        r_b = zr[:, Do:]
        zslab[r0:r0 + N, :] = (z_b * sts[r0:r0 + N, :]).astype(c)
        rslab[r0:r0 + N, :] = r_b

    # ---- candidate: z*state contribution (x contribution already in tux) ----
    zs = zslab[...]
    tu = tux + jnp.dot(zs, wus_ref[0], preferred_element_type=f32)
    for k in range(1, cheb_k):
        s_k = supp_ref[k - 1]
        for b in range(b_tile):
            r0 = b * N
            pz_b = jnp.dot(s_k, zs[r0:r0 + N, :], preferred_element_type=f32)
            pzslab[r0:r0 + N, :] = pz_b.astype(c)
        tu = tu + jnp.dot(pzslab[...], wus_ref[k], preferred_element_type=f32)

    # ---- candidate epilogue + GRU combine ----
    for b in range(b_tile):
        r0 = b * N
        uu = tu[r0:r0 + N, :] * embu
        hc = jnp.tanh(
            jnp.dot(uu.astype(c), selu_ref[...], preferred_element_type=f32)
            + bu)
        r_b = rslab[r0:r0 + N, :]
        s_b = sts[r0:r0 + N, :]
        hout_ref[r0:r0 + N, :] = r_b * s_b + (1.0 - r_b) * hc


# ---------------------------------------------------------------------------
# Per-sequence parameter preprocessing (hoisted out of the recurrent step).
# ---------------------------------------------------------------------------
def prepare_agcrn_params(node_embeddings, params, *, dim_in, dim_out,
                         mxu_dtype=jnp.float32):
    f32 = jnp.float32
    De = node_embeddings.shape[-1]
    Do = dim_out
    cin = dim_in + Do

    def wpool(wp):
        # (De, K, cin, O) -> (K, cin, De*O), lanes ordered (d, o).
        de, k, ci, o = wp.shape
        return jnp.transpose(wp, (1, 2, 0, 3)).reshape(k, ci, de * o)

    wg = wpool(params["gate_w"]).astype(mxu_dtype)              # (K, cin, De*2Do)
    wu_full = wpool(params["update_w"])                         # (K, cin, De*Do)
    is_x_row = (jnp.arange(cin) < dim_in)[None, :, None]
    wux = jnp.where(is_x_row, wu_full, 0.0).astype(mxu_dtype)   # x rows only
    wus = wu_full[:, dim_in:, :].astype(mxu_dtype)              # state rows only

    # 0/1 block-sum matrices: out[:, o] = sum_d T[:, d*O + o].
    sel_g = jnp.tile(jnp.eye(2 * Do, dtype=f32), (De, 1)).astype(mxu_dtype)
    sel_u = jnp.tile(jnp.eye(Do, dtype=f32), (De, 1)).astype(mxu_dtype)

    # emb[n, d] pre-broadcast along the output lane axis; kept (N, .) and
    # reused per batch sub-block inside the kernel (no B-tiled copies).
    embrep_g = jnp.repeat(node_embeddings, 2 * Do, axis=1).astype(f32)
    embrep_u = jnp.repeat(node_embeddings, Do, axis=1).astype(f32)

    bias_w = jnp.concatenate([params["gate_b"], params["update_b"]],
                             axis=1).astype(f32)                # (De, 3*Do)

    return dict(node_embeddings=node_embeddings.astype(f32),
                qz_w=params["qz_w"].astype(f32),
                qz_b=params["qz_b"].reshape(1, -1).astype(f32),
                bias_w=bias_w, wg=wg, wux=wux, wus=wus,
                sel_g=sel_g, sel_u=sel_u,
                embrep_g=embrep_g, embrep_u=embrep_u,
                mxu_dtype=mxu_dtype, dim_in=dim_in, dim_out=dim_out)


def _pick_b_tile(B, N, embed_dim, dim_out, budget_bytes=16 << 20):
    # Largest divisor of B whose ~4 live (BT*N, De*2Do) f32 slabs fit the
    # budget (v7x has only 64 MiB VMEM, half of v5e/v6e -> keep headroom).
    for bt in sorted((d for d in range(1, B + 1) if B % d == 0), reverse=True):
        if bt != B and (bt * N) % 8:
            continue
        if 4 * bt * N * embed_dim * 2 * dim_out * 4 <= budget_bytes:
            return bt
    return 1


def agcrn_cell_forward(x, state, h, eps, prep, *, temperature=2.0 / 3.0,
                       b_tile=None):
    f32 = jnp.float32
    B, N, dim_in = x.shape
    Do = prep["dim_out"]
    De = prep["node_embeddings"].shape[-1]
    cin = dim_in + Do
    cheb_k = prep["wg"].shape[0]
    c = prep["mxu_dtype"]
    two_do = 2 * Do
    assert cheb_k >= 2, "cheb_k >= 2 required"

    def full_spec(a):
        nd = a.ndim
        return pl.BlockSpec(a.shape, lambda i, _nd=nd: (0,) * _nd)

    # ----------------- stage 1: mask / supports / biases -----------------
    s1_inputs = (prep["node_embeddings"], h, eps, prep["qz_w"], prep["qz_b"],
                 prep["bias_w"])
    mask, supports, bias_zr, bias_u = pl.pallas_call(
        functools.partial(_mask_supports_bias_kernel, node_num=N,
                          cheb_k=cheb_k, temperature=temperature,
                          two_dout=two_do),
        grid=(1,),
        in_specs=[full_spec(a) for a in s1_inputs],
        out_specs=(pl.BlockSpec((N, N), lambda i: (0, 0)),
                   pl.BlockSpec((cheb_k - 1, N, N), lambda i: (0, 0, 0)),
                   pl.BlockSpec((N, two_do), lambda i: (0, 0)),
                   pl.BlockSpec((N, Do), lambda i: (0, 0))),
        out_shape=(jax.ShapeDtypeStruct((N, N), f32),
                   jax.ShapeDtypeStruct((cheb_k - 1, N, N), f32),
                   jax.ShapeDtypeStruct((N, two_do), f32),
                   jax.ShapeDtypeStruct((N, Do), f32)),
        compiler_params=pltpu.CompilerParams(
            dimension_semantics=("arbitrary",)),
    )(*s1_inputs)

    # ----------------- stage 2: batched graph-conv GRU -------------------
    if b_tile is None:
        b_tile = _pick_b_tile(B, N, De, Do)
    assert B % b_tile == 0
    bt = b_tile

    # k=0 gate features pre-concatenated in the wrapper (one K=cin matmul);
    # state kept separately in f32 for the GRU combine.
    xst = jnp.concatenate([x, state], axis=-1).reshape(B * N, cin).astype(c)
    sts = state.reshape(B * N, Do).astype(f32)
    supports_c = supports.astype(c)

    s2_inputs = (xst, sts, supports_c, prep["wg"], prep["wux"], prep["wus"],
                 prep["sel_g"], prep["sel_u"], prep["embrep_g"],
                 prep["embrep_u"], bias_zr, bias_u)

    in_specs = [pl.BlockSpec((bt * N, cin), lambda i: (i, 0)),
                pl.BlockSpec((bt * N, Do), lambda i: (i, 0))]
    in_specs += [full_spec(a) for a in s2_inputs[2:]]

    # Explicit VMEM budget (review: v7x 64 MiB, scoped default 32 MiB).
    in_bytes = sum(int(a.size) * a.dtype.itemsize for a in s2_inputs)
    live_bytes = 4 * bt * N * De * two_do * 4 + bt * N * (cin + 3 * Do) * 4
    vmem_limit = int(min(max(2 * (in_bytes + live_bytes) + (4 << 20),
                             32 << 20), 56 << 20))

    h_flat = pl.pallas_call(
        functools.partial(_agcrn_batch_kernel, b_tile=bt, node_num=N,
                          cheb_k=cheb_k, dim_out=Do, mxu_dtype=c),
        grid_spec=pltpu.PrefetchScalarGridSpec(
            num_scalar_prefetch=0,
            grid=(B // bt,),
            in_specs=in_specs,
            out_specs=pl.BlockSpec((bt * N, Do), lambda i: (i, 0)),
            scratch_shapes=[pltpu.VMEM((bt * N, cin), c),   # propagated x||state
                            pltpu.VMEM((bt * N, Do), c),    # propagated z*state
                            pltpu.VMEM((bt * N, Do), c),    # z*state
                            pltpu.VMEM((bt * N, Do), f32)]),  # r
        out_shape=jax.ShapeDtypeStruct((B * N, Do), f32),
        compiler_params=pltpu.CompilerParams(
            dimension_semantics=("parallel",),
            vmem_limit_bytes=vmem_limit),
    )(*s2_inputs)

    return h_flat.reshape(B, N, Do), mask


# ---------------------------------------------------------------------------
# Pure-JAX reference mirroring the (assumed) PyTorch semantics.
# ---------------------------------------------------------------------------
def reference_forward(x, state, emb, h, eps, params, *, cheb_k, temperature):
    N = emb.shape[0]
    dim_out = state.shape[-1]

    qz_loga = h @ params["qz_w"] + params["qz_b"]
    y = jax.nn.sigmoid((jnp.log(eps) - jnp.log(1.0 - eps) + qz_loga)
                       / temperature)
    mask = jnp.clip(y * (LIMIT_B - LIMIT_A) + LIMIT_A, 0.0, 1.0)

    supports = jax.nn.softmax(jnp.maximum(emb @ emb.T, 0.0), axis=-1) * mask
    sset = [jnp.eye(N, dtype=jnp.float32), supports]
    for _ in range(2, cheb_k):
        sset.append(2.0 * supports @ sset[-1] - sset[-2])
    S = jnp.stack(sset, axis=0)                                   # (K, N, N)

    def avwgcn(xin, wp, bp):
        w = jnp.einsum("nd,dkio->nkio", emb, wp)
        b = emb @ bp
        xg = jnp.einsum("knm,bmc->bknc", S, xin)
        xg = jnp.transpose(xg, (0, 2, 1, 3))
        return jnp.einsum("bnki,nkio->bno", xg, w) + b

    cat1 = jnp.concatenate([x, state], axis=-1)
    z_r = jax.nn.sigmoid(avwgcn(cat1, params["gate_w"], params["gate_b"]))
    z, r = z_r[..., :dim_out], z_r[..., dim_out:]
    cat2 = jnp.concatenate([x, z * state], axis=-1)
    hc = jnp.tanh(avwgcn(cat2, params["update_w"], params["update_b"]))
    return r * state + (1.0 - r) * hc, mask


if __name__ == "__main__":
    B, N = 2, 16
    dim_in, dim_out = 4, 32
    cheb_k, embed_dim, hyper_dim = 2, 8, 10
    temperature = 2.0 / 3.0
    cin = dim_in + dim_out

    key = jax.random.PRNGKey(0)
    ks = jax.random.split(key, 12)
    x = jax.random.normal(ks[0], (B, N, dim_in), jnp.float32)
    state = jax.random.normal(ks[1], (B, N, dim_out), jnp.float32)
    emb = jax.random.normal(ks[2], (N, embed_dim), jnp.float32)
    h = jax.random.normal(ks[3], (N, hyper_dim), jnp.float32)
    # get_eps(): uniform(epsilon, 1-epsilon) noise for the concrete distribution
    eps = jax.random.uniform(ks[4], (N, N), jnp.float32,
                             minval=EPSILON, maxval=1.0 - EPSILON)

    params = {
        "qz_w": 0.1 * jax.random.normal(ks[5], (hyper_dim, N), jnp.float32),
        "qz_b": 0.1 * jax.random.normal(ks[6], (N,), jnp.float32),
        "gate_w": 0.1 * jax.random.normal(
            ks[7], (embed_dim, cheb_k, cin, 2 * dim_out), jnp.float32),
        "gate_b": 0.1 * jax.random.normal(ks[8], (embed_dim, 2 * dim_out),
                                          jnp.float32),
        "update_w": 0.1 * jax.random.normal(
            ks[9], (embed_dim, cheb_k, cin, dim_out), jnp.float32),
        "update_b": 0.1 * jax.random.normal(ks[10], (embed_dim, dim_out),
                                            jnp.float32),
    }

    h_ref, mask_r = reference_forward(x, state, emb, h, eps, params,
                                      cheb_k=cheb_k, temperature=temperature)

    # 1) f32 MXU path with b_tile=1 -> a 2-step parallel batch grid
    #    (exercises the pipelined / megacore-shardable path), tight tolerances.
    prep32 = prepare_agcrn_params(emb, params, dim_in=dim_in, dim_out=dim_out,
                                  mxu_dtype=jnp.float32)
    h32, m32 = agcrn_cell_forward(x, state, h, eps, prep32,
                                  temperature=temperature, b_tile=1)
    jax.block_until_ready((h32, m32))
    assert h32.shape == (B, N, dim_out) and m32.shape == (N, N)
    assert jnp.allclose(m32, mask_r, atol=1e-5, rtol=1e-5), "mask mismatch (f32)"
    assert jnp.allclose(h32, h_ref, atol=2e-3, rtol=2e-3), "hidden mismatch (f32)"

    # 2) bf16 MXU operands (production config), auto batch tile; the L0 /
    #    mask path stays f32 so its tolerance is unchanged; the hidden state
    #    is checked at a bf16-appropriate tolerance.
    prep16 = prepare_agcrn_params(emb, params, dim_in=dim_in, dim_out=dim_out,
                                  mxu_dtype=jnp.bfloat16)
    h16, m16 = agcrn_cell_forward(x, state, h, eps, prep16,
                                  temperature=temperature)
    jax.block_until_ready((h16, m16))
    assert jnp.allclose(m16, mask_r, atol=1e-5, rtol=1e-5), "mask mismatch (bf16)"
    assert jnp.allclose(h16, h_ref, atol=5e-2, rtol=5e-2), "hidden mismatch (bf16)"

    print("KERNEL_OK")
</pallas_src>

<mosaic_0001>
module attributes {stable_mosaic.version = 11 : i64} {
  func.func @_mask_supports_bias_kernel(%arg0: i32, %arg1: memref<16x8xf32, #tpu.memory_space<vmem>>, %arg2: memref<16x10xf32, #tpu.memory_space<vmem>>, %arg3: memref<16x16xf32, #tpu.memory_space<vmem>>, %arg4: memref<10x16xf32, #tpu.memory_space<vmem>>, %arg5: memref<1x16xf32, #tpu.memory_space<vmem>>, %arg6: memref<8x96xf32, #tpu.memory_space<vmem>>, %arg7: memref<16x16xf32, #tpu.memory_space<vmem>>, %arg8: memref<1x16x16xf32, #tpu.memory_space<vmem>>, %arg9: memref<16x64xf32, #tpu.memory_space<vmem>>, %arg10: memref<16x32xf32, #tpu.memory_space<vmem>>) attributes {dimension_semantics = [#tpu.dimension_semantics<arbitrary>], iteration_bounds = array<i64: 1>, scalar_prefetch = 0 : i64, scratch_operands = 0 : i64, tpu.core_type = #tpu.core_type<tc>, window_params = [{pipeline_mode = #tpu.pipeline_mode<synchronous>, transform_indices = @transform_0, window_bounds = array<i64: 16, 8>}, {pipeline_mode = #tpu.pipeline_mode<synchronous>, transform_indices = @transform_1, window_bounds = array<i64: 16, 10>}, {pipeline_mode = #tpu.pipeline_mode<synchronous>, transform_indices = @transform_2, window_bounds = array<i64: 16, 16>}, {pipeline_mode = #tpu.pipeline_mode<synchronous>, transform_indices = @transform_3, window_bounds = array<i64: 10, 16>}, {pipeline_mode = #tpu.pipeline_mode<synchronous>, transform_indices = @transform_4, window_bounds = array<i64: 1, 16>}, {pipeline_mode = #tpu.pipeline_mode<synchronous>, transform_indices = @transform_5, window_bounds = array<i64: 8, 96>}, {pipeline_mode = #tpu.pipeline_mode<synchronous>, transform_indices = @transform_6, window_bounds = array<i64: 16, 16>}, {pipeline_mode = #tpu.pipeline_mode<synchronous>, transform_indices = @transform_7, window_bounds = array<i64: 1, 16, 16>}, {pipeline_mode = #tpu.pipeline_mode<synchronous>, transform_indices = @transform_8, window_bounds = array<i64: 16, 64>}, {pipeline_mode = #tpu.pipeline_mode<synchronous>, transform_indices = @transform_9, window_bounds = array<i64: 16, 32>}]} {
    %c0 = arith.constant 0 : index
    %c0_0 = arith.constant 0 : index
    %0 = vector.load %arg1[%c0, %c0_0] : memref<16x8xf32, #tpu.memory_space<vmem>>, vector<16x8xf32>
    %c0_1 = arith.constant 0 : index
    %c0_2 = arith.constant 0 : index
    %1 = vector.load %arg3[%c0_1, %c0_2] : memref<16x16xf32, #tpu.memory_space<vmem>>, vector<16x16xf32>
    %c0_3 = arith.constant 0 : index
    %c0_4 = arith.constant 0 : index
    %2 = vector.load %arg2[%c0_3, %c0_4] : memref<16x10xf32, #tpu.memory_space<vmem>>, vector<16x10xf32>
    %c0_5 = arith.constant 0 : index
    %c0_6 = arith.constant 0 : index
    %3 = vector.load %arg4[%c0_5, %c0_6] : memref<10x16xf32, #tpu.memory_space<vmem>>, vector<10x16xf32>
    %cst = arith.constant dense<0.000000e+00> : vector<16x16xf32>
    %4 = tpu.matmul %2, %3, %cst {dimension_numbers = #tpu.dot_dimension_numbers<[1], [0], [0], [1], [0, 0, 1, 1], [], []>} : vector<16x10xf32>, vector<10x16xf32>, vector<16x16xf32> -> vector<16x16xf32>
    %c0_7 = arith.constant 0 : index
    %c0_8 = arith.constant 0 : index
    %5 = vector.load %arg5[%c0_7, %c0_8] : memref<1x16xf32, #tpu.memory_space<vmem>>, vector<1x16xf32>
    %6 = vector.broadcast %5 : vector<1x16xf32> to vector<16x16xf32>
    %7 = arith.addf %4, %6 : vector<16x16xf32>
    %8 = math.log %1 : vector<16x16xf32>
    %cst_9 = arith.constant 1.000000e+00 : f32
    %9 = vector.broadcast %cst_9 : f32 to vector<16x16xf32>
    %10 = arith.subf %9, %1 : vector<16x16xf32>
    %11 = math.log %10 : vector<16x16xf32>
    %12 = arith.subf %8, %11 : vector<16x16xf32>
    %13 = arith.addf %12, %7 : vector<16x16xf32>
    %cst_10 = arith.constant 1.500000e+00 : f32
    %14 = vector.broadcast %cst_10 : f32 to vector<16x16xf32>
    %15 = arith.mulf %13, %14 : vector<16x16xf32>
    %16 = arith.negf %15 : vector<16x16xf32>
    %17 = math.exp %16 : vector<16x16xf32>
    %cst_11 = arith.constant 1.000000e+00 : f32
    %18 = vector.broadcast %cst_11 : f32 to vector<16x16xf32>
    %19 = arith.addf %18, %17 : vector<16x16xf32>
    %20 = arith.divf %18, %19 : vector<16x16xf32>
    %cst_12 = arith.constant 1.200000e+00 : f32
    %21 = vector.broadcast %cst_12 : f32 to vector<16x16xf32>
    %22 = arith.mulf %20, %21 : vector<16x16xf32>
    %cst_13 = arith.constant -1.000000e-01 : f32
    %23 = vector.broadcast %cst_13 : f32 to vector<16x16xf32>
    %24 = arith.addf %22, %23 : vector<16x16xf32>
    %cst_14 = arith.constant 0.000000e+00 : f32
    %cst_15 = arith.constant 1.000000e+00 : f32
    %25 = vector.broadcast %cst_14 : f32 to vector<16x16xf32>
    %26 = arith.maximumf %25, %24 : vector<16x16xf32>
    %27 = vector.broadcast %cst_15 : f32 to vector<16x16xf32>
    %28 = arith.minimumf %27, %26 : vector<16x16xf32>
    %c0_16 = arith.constant 0 : index
    %c0_17 = arith.constant 0 : index
    %29 = vector.load %arg7[%c0_16, %c0_17] : memref<16x16xf32, #tpu.memory_space<vmem>>, vector<16x16xf32>
    tpu.vector_store %arg7[%c0_16, %c0_17], %28 {strides = array<i32>} : memref<16x16xf32, #tpu.memory_space<vmem>>, vector<16x16xf32>,
    %30 = tpu.transpose %0, [1, 0] : vector<16x8xf32> -> vector<8x16xf32>
    %cst_18 = arith.constant dense<0.000000e+00> : vector<16x16xf32>
    %31 = tpu.matmul %0, %30, %cst_18 {dimension_numbers = #tpu.dot_dimension_numbers<[1], [0], [0], [1], [0, 0, 1, 1], [], []>} : vector<16x8xf32>, vector<8x16xf32>, vector<16x16xf32> -> vector<16x16xf32>
    %cst_19 = arith.constant 0.000000e+00 : f32
    %32 = vector.broadcast %cst_19 : f32 to vector<16x16xf32>
    %33 = arith.maximumf %31, %32 : vector<16x16xf32>
    %cst_20 = arith.constant dense<0xFF800000> : vector<16xf32>
    %34 = vector.multi_reduction <maximumf>, %33, %cst_20 [1] : vector<16x16xf32> to vector<16xf32>
    %cst_21 = arith.constant 0xFF800000 : f32
    %35 = vector.broadcast %cst_21 : f32 to vector<16xf32>
    %36 = arith.maximumf %35, %34 : vector<16xf32>
    %37 = vector.shape_cast %36 : vector<16xf32> to vector<16x1xf32>
    %38 = vector.broadcast %37 : vector<16x1xf32> to vector<16x16xf32>
    %39 = arith.subf %33, %38 : vector<16x16xf32>
    %40 = math.exp %39 : vector<16x16xf32>
    %cst_22 = arith.constant dense<0.000000e+00> : vector<16xf32>
    %41 = vector.multi_reduction <add>, %40, %cst_22 [1] : vector<16x16xf32> to vector<16xf32>
    %42 = vector.shape_cast %41 : vector<16xf32> to vector<16x1xf32>
    %43 = vector.broadcast %42 : vector<16x1xf32> to vector<16x16xf32>
    %44 = arith.divf %40, %43 : vector<16x16xf32>
    %45 = arith.mulf %44, %28 : vector<16x16xf32>
    %c0_23 = arith.constant 0 : index
    %c0_24 = arith.constant 0 : index
    %c0_25 = arith.constant 0 : index
    %46 = vector.load %arg8[%c0_23, %c0_24, %c0_25] : memref<1x16x16xf32, #tpu.memory_space<vmem>>, vector<1x16x16xf32>
    %47 = vector.shape_cast %46 : vector<1x16x16xf32> to vector<16x16xf32>
    %48 = vector.shape_cast %45 : vector<16x16xf32> to vector<1x16x16xf32>
    tpu.vector_store %arg8[%c0_23, %c0_24, %c0_25], %48 {strides = array<i32>} : memref<1x16x16xf32, #tpu.memory_space<vmem>>, vector<1x16x16xf32>,
    %c0_26 = arith.constant 0 : index
    %c0_27 = arith.constant 0 : index
    %49 = vector.load %arg6[%c0_26, %c0_27] : memref<8x96xf32, #tpu.memory_space<vmem>>, vector<8x96xf32>
    %cst_28 = arith.constant dense<0.000000e+00> : vector<16x96xf32>
    %50 = tpu.matmul %0, %49, %cst_28 {dimension_numbers = #tpu.dot_dimension_numbers<[1], [0], [0], [1], [0, 0, 1, 1], [], []>} : vector<16x8xf32>, vector<8x96xf32>, vector<16x96xf32> -> vector<16x96xf32>
    %51 = vector.extract_strided_slice %50 {offsets = [0, 0], sizes = [16, 64], strides = [1, 1]} : vector<16x96xf32> to vector<16x64xf32>
    %c0_29 = arith.constant 0 : index
    %c0_30 = arith.constant 0 : index
    %52 = vector.load %arg9[%c0_29, %c0_30] : memref<16x64xf32, #tpu.memory_space<vmem>>, vector<16x64xf32>
    tpu.vector_store %arg9[%c0_29, %c0_30], %51 {strides = array<i32>} : memref<16x64xf32, #tpu.memory_space<vmem>>, vector<16x64xf32>,
    %53 = vector.extract_strided_slice %50 {offsets = [0, 64], sizes = [16, 32], strides = [1, 1]} : vector<16x96xf32> to vector<16x32xf32>
    %c0_31 = arith.constant 0 : index
    %c0_32 = arith.constant 0 : index
    %54 = vector.load %arg10[%c0_31, %c0_32] : memref<16x32xf32, #tpu.memory_space<vmem>>, vector<16x32xf32>
    tpu.vector_store %arg10[%c0_31, %c0_32], %53 {strides = array<i32>} : memref<16x32xf32, #tpu.memory_space<vmem>>, vector<16x32xf32>,
    return
  }
  func.func @transform_0(%arg0: i32) -> (i32, i32) {
    %c0_i32 = arith.constant 0 : i32
    %c0_i32_0 = arith.constant 0 : i32
    %c0_i32_1 = arith.constant 0 : i32
    return %c0_i32, %c0_i32_0 : i32, i32
  }
  func.func @transform_1(%arg0: i32) -> (i32, i32) {
    %c0_i32 = arith.constant 0 : i32
    %c0_i32_0 = arith.constant 0 : i32
    %c0_i32_1 = arith.constant 0 : i32
    return %c0_i32, %c0_i32_0 : i32, i32
  }
  func.func @transform_2(%arg0: i32) -> (i32, i32) {
    %c0_i32 = arith.constant 0 : i32
    %c0_i32_0 = arith.constant 0 : i32
    %c0_i32_1 = arith.constant 0 : i32
    return %c0_i32, %c0_i32_0 : i32, i32
  }
  func.func @transform_3(%arg0: i32) -> (i32, i32) {
    %c0_i32 = arith.constant 0 : i32
    %c0_i32_0 = arith.constant 0 : i32
    %c0_i32_1 = arith.constant 0 : i32
    return %c0_i32, %c0_i32_0 : i32, i32
  }
  func.func @transform_4(%arg0: i32) -> (i32, i32) {
    %c0_i32 = arith.constant 0 : i32
    %c0_i32_0 = arith.constant 0 : i32
    %c0_i32_1 = arith.constant 0 : i32
    return %c0_i32, %c0_i32_0 : i32, i32
  }
  func.func @transform_5(%arg0: i32) -> (i32, i32) {
    %c0_i32 = arith.constant 0 : i32
    %c0_i32_0 = arith.constant 0 : i32
    %c0_i32_1 = arith.constant 0 : i32
    return %c0_i32, %c0_i32_0 : i32, i32
  }
  func.func @transform_6(%arg0: i32) -> (i32, i32) {
    %c0_i32 = arith.constant 0 : i32
    %c0_i32_0 = arith.constant 0 : i32
    %c0_i32_1 = arith.constant 0 : i32
    return %c0_i32, %c0_i32_0 : i32, i32
  }
  func.func @transform_7(%arg0: i32) -> (i32, i32, i32) {
    %c0_i32 = arith.constant 0 : i32
    %c0_i32_0 = arith.constant 0 : i32
    %c0_i32_1 = arith.constant 0 : i32
    %c0_i32_2 = arith.constant 0 : i32
    return %c0_i32, %c0_i32_0, %c0_i32_1 : i32, i32, i32
  }
  func.func @transform_8(%arg0: i32) -> (i32, i32) {
    %c0_i32 = arith.constant 0 : i32
    %c0_i32_0 = arith.constant 0 : i32
    %c0_i32_1 = arith.constant 0 : i32
    return %c0_i32, %c0_i32_0 : i32, i32
  }
  func.func @transform_9(%arg0: i32) -> (i32, i32) {
    %c0_i32 = arith.constant 0 : i32
    %c0_i32_0 = arith.constant 0 : i32
    %c0_i32_1 = arith.constant 0 : i32
    return %c0_i32, %c0_i32_0 : i32, i32
  }
}

</mosaic_0001>

<bundles_post_ra>
// kernel: tpu_custom_call.1
= control target key start
LH: loop header
LB: loop body
LE: loop exit
PB: predicated region body
PF: predicated region fallthrough
CT: control target
= control target key end

     0   :  { %15 = vsyncpa [#allocation3], 0  ;;  %s856_s0 = inlined_call_operand.vmem [shape: f32[16,8], index: 0, kind: input, shape index: {}]   ;;  %s857_s1 = inlined_call_operand.vmem [shape: f32[16,10], index: 1, kind: input, shape index: {}]   ;;  %s858_s2 = inlined_call_operand.hbm [shape: f32[16,16], index: 2, kind: input, shape index: {}]   ;;  %s859_s3 = inlined_call_operand.vmem [shape: f32[10,16], index: 3, kind: input, shape index: {}]   ;;  %s860_s4 = inlined_call_operand.vmem [shape: f32[1,16], index: 4, kind: input, shape index: {}]   ;;  %s861_s5 = inlined_call_operand.vmem [shape: f32[8,96], index: 5, kind: input, shape index: {}]   ;;  %s862_s6 = inlined_call_operand.hbm [shape: f32[16,16], index: 6, kind: output, shape index: {0}]   ;;  %s863_s7 = inlined_call_operand.hbm [shape: f32[1,16,16], index: 7, kind: output, shape index: {1}]   ;;  %s864_s8 = inlined_call_operand.hbm [shape: f32[16,64], index: 8, kind: output, shape index: {2}]   ;;  %s865_s9 = inlined_call_operand.hbm [shape: f32[16,32], index: 9, kind: output, shape index: {3}]  }
   0x1   :  { %16 = vsyncpa [#allocation4], 0 }
   0x2   :  { %17 = vsyncpa [#allocation7], 0 }
   0x3   :  { %18 = vsyncpa [#allocation10], 0  ;;  %s653_s30 = smov [#allocation2]   ;;  %s535_s13 = scalar_lea.hbm %s858_s2, 256 }
   0x4   :  { %s28_s10 = sshll.u32 %s653_s30, 4  ;;  %p536_p0 = scmp.ne.s32.totalorder %s858_s2, %s535_s13  ;;  %s29_s10 = int_to_ptr.vmem [resolvable:$true] %s28_s10 }
   0x5   :  { %p539_p1 = scmp.lt.u32.totalorder %s535_s13, %s858_s2 }
   0x7   :  { %p541_p2 = pnand %p539_p1, %p536_p0 }
   0x9   :  { %544 = shalt.err (!%p541_p2)
}
   0xa   :  { %s545_s18 = scalar_lea.vmem %s29_s10, 256  ;;  %p550_p4 = scmp.lt.s32.totalorder %s29_s10, %s29_s10 }
   0xb   :  { %p546_p3 = scmp.ne.s32.totalorder %s29_s10, %s545_s18  ;;  %p551_p5 = scmp.lt.s32.totalorder %s545_s18, %s545_s18 }
   0xd   :  { %p552_p6 = por %p551_p5, %p550_p4 }
   0xf   :  { %p553_p7 = pnand %p552_p6, %p546_p3 }
  0x11   :  { %556 = shalt.err (!%p553_p7)
}
  0x12   :  { %s654_s19 = smov 128   ;;  %s655_s20 = smov 8  }
  0x13   :  { %34 = dma.hbm_to_vmem [thread:$0]  %s858_s2, 256, %s29_s10, [#allocation3], %s654_s19, %s654_s19, %s655_s20  }
  0x14   :  { %645 = dma.done.wait [#allocation3], 256  }
  0x15   :  { %646 = vsyncadd [#allocation3], 4294967040  ;;  %vm184_vm0 = vcmask 64512   ;;  %vm66_vm1 = vcmask 1041408   ;;  %vm59_vm3 = vcmask 80896   ;;  %v44_v0 = vld [vmem:[%s856_s0] sm:$0xff] }
  0x16   :  { %vm497_vm2 = vmpackc.low %vm184_vm0, %vm184_vm0  ;;  %v45_v1 = vld [vmem:[%s856_s0 + $0x8] sm:$0xff]  ;;  %v50_v2 = vld [vmem:[%s859_s3] sm:$0xff]  ;;  %482 = vmatprep.mubr.msk.f32.mxu1 %vm184_vm0, %v44_v0  ;;  %vm656_vm4 = vmmov 1   ;;  %vm181_vm6 = vcmask 130048   ;;  %vm370_vm7 = vcmask 523264   ;;  %vm381_vm8 = vcmask 261120  }
  0x17   :  { %v496_v3 = vpack.c.bf16 %v45_v1, %v44_v0  ;;  %v51_v4 = vld [vmem:[%s859_s3 + $0x8] sm:$0x3]  ;;  %vm491_vm5 = vmpackc.low %vm66_vm1, %vm656_vm4  ;;  %v48_v5 = vld [vmem:[%s857_s1] sm:$0xff] }
  0x18   :  { %v490_v6 = vpack.c.bf16 %v51_v4, %v50_v2  ;;  %475 = vmatprep.mubr.msk.f32.mxu0 %vm59_vm3, %v48_v5  ;;  %v294_v7 = vld [vmem:[%s861_s5] sm:$0xff]  ;;  %v49_v8 = vld [vmem:[%s857_s1 + $0x8] sm:$0xff]  ;;  %s657_s1 = smov 64  }
  0x19   :  { %498 = vmatprep.subr.msk.bf16.mxu1 %vm497_vm2, %v496_v3  ;;  %v47_v15 = vld [vmem:[#allocation2 + $0x8] sm:$0xff]  ;;  %v46_v17 = vld [vmem:[#allocation2] sm:$0xff] }
  0x1a   :  { %501 = vmatpush3.bf16.xpose.msk.msra.mxu1 %vm497_vm2, %v496_v3  ;;  %492 = vmatprep.subr.msk.bf16.mxu0 %vm491_vm5, %v490_v6  ;;  %511 = vlog2.f32 %v47_v15  ;;  %v150_v18 = vsub.f32 1.0, %v47_v15  ;;  %v149_v20 = vsub.f32 1.0, %v46_v17  ;;  %v448_v29 = vld [vmem:[%s860_s4] ss:$0 sm:$0xff]  ;;  %s658_s4 = smov [#allocation5]  }
  0x1b   :  { %495 = vmatpush3.bf16.msk.msra.mxu0 %vm491_vm5, %v490_v6  ;;  %513 = vlog2.f32 %v46_v17  ;;  %s389_s14 = sshll.u32 %s658_s4, 4  ;;  %s390_s14 = int_to_ptr.vmem [resolvable:$true] %s389_s14 }
  0x1c   :  { %485 = vmatprep.subr.mxu0 %v294_v7  ;;  %515 = vlog2.f32 %v150_v18  ;;  %s557_s15 = scalar_lea.vmem %s390_s14, 256  ;;  %p562_p9 = scmp.lt.s32.totalorder %s390_s14, %s390_s14 }
  0x1d   :  { %517 = vlog2.f32 %v149_v20  ;;  %p558_p8 = scmp.ne.s32.totalorder %s390_s14, %s557_s15  ;;  %p563_p10 = scmp.lt.s32.totalorder %s557_s15, %s557_s15 }
  0x1e   :  { %476 = vmatmul.mubr.msk.f32.vlgmr.msra.gmra.mrb[0].mxu0 %vm59_vm3, %v49_v8 }
  0x1f   :  { %486 = vmatpush3.msra.mxu0 %v294_v7  ;;  %487 = vmatprep.mubr.msk.f32.mxu0 %vm184_vm0, %v44_v0  ;;  %p564_p11 = por %p563_p10, %p562_p9 }
  0x21   :  { %483 = vmatmul.mubr.msk.f32.vlgmr.msra.gmra.mrb[0].mxu1 %vm184_vm0, %v45_v1  ;;  %p565_p12 = pnand %p564_p11, %p558_p8 }
  0x22   :  { %488 = vmatmul.mubr.msk.f32.vlgmr.msra.gmra.mrb[2].mxu0 %vm184_vm0, %v45_v1 }
  0x24   :  { %v512_v23 = vpop.eup %511 }
  0x25   :  { %v514_v24 = vpop.eup %513  ;;  %v148_v27 = vmul.f32 0.6931472, %v512_v23 }
  0x26   :  { %v516_v25 = vpop.eup %515  ;;  %v146_v30 = vmul.f32 0.6931472, %v514_v24 }
  0x27   :  { %v518_v26 = vpop.eup %517  ;;  %v154_v28 = vmul.f32 0.6931472, %v516_v25 }
  0x28   :  { %v152_v31 = vmul.f32 0.6931472, %v518_v26 }
  0x29   :  { %v156_v33 = vsub.f32 %v148_v27, %v154_v28 }
  0x2a   :  { %v155_v35 = vsub.f32 %v146_v30, %v152_v31 }
  0xf1   :  { %v477_v16 = vpop.f32.mrb[0].mxu0 }
  0xf2   :  { %v136_v19 = vpop.f32.mrb[1].mxu0  ;;  %v142_v32 = vadd.f32 %v477_v16, %v448_v29 }
  0xf3   :  { %v137_v34 = vadd.f32 %v448_v29, %v136_v19 }
  0xf4   :  { %v756_v9 = vpop.f32.mrb[0].mxu1  ;;  %v158_v36 = vadd.f32 %v156_v33, %v142_v32 }
  0xf5   :  { %v758_v10 = vpop.f32.mrb[1].mxu1  ;;  %v267_v12 = vmax.f32 %v756_v9, 0.0  ;;  %v489_v21 = vpop.f32.mrb[2].mxu0  ;;  %v157_v37 = vadd.f32 %v155_v35, %v137_v34 }
  0xf6   :  { %v266_v11 = vmax.f32 %v758_v10, 0.0  ;;  %372 = vst.msk [vmem:[#allocation8 + $0x8] sm:$0xff] %vm370_vm7, %v489_v21  ;;  %v361_v22 = vpop.f32.mrb[3].mxu0  ;;  %v453_v38 = vmul.f32 -1.5, %v158_v36 }
  0xf7   :  { %v271_v14 = vsel %vm181_vm6, %v267_v12, -inf  ;;  %371 = vst.msk [vmem:[#allocation8] sm:$0xff] %vm370_vm7, %v361_v22  ;;  %v452_v39 = vmul.f32 -1.5, %v157_v37 }
  0xf8   :  { %v268_v13 = vsel %vm181_vm6, %v266_v11, -inf  ;;  %v165_v40 = vmul.f32 1.442695, %v453_v38 }
  0xf9   :  { %269 = vmax.xlane.f32.xlu0 %v268_v13  ;;  %v163_v41 = vmul.f32 1.442695, %v452_v39 }
  0xfa   :  { %519 = vpow2.f32 %v165_v40 }
  0xfb   :  { %521 = vpow2.f32 %v163_v41 }
  0xfd   :  { %272 = vmax.xlane.f32.xlu0 %v271_v14 }
 0x104   :  { %v520_v42 = vpop.eup %519 }
 0x105   :  { %v522_v43 = vpop.eup %521  ;;  %v168_v44 = vadd.f32 1.0, %v520_v42 }
 0x106   :  { %v167_v45 = vadd.f32 1.0, %v522_v43 }
 0x107   :  { %523 = vrcp.f32 %v168_v44 }
 0x108   :  { %525 = vrcp.f32 %v167_v45 }
 0x111   :  { %v524_v46 = vpop.eup %523 }
 0x112   :  { %v526_v47 = vpop.eup %525  ;;  %v174_v48 = vmul.f32 1.2, %v524_v46 }
 0x113   :  { %375 = vrot.lane.b32.xlu0 %v361_v22, %s657_s1  ;;  %v173_v49 = vmul.f32 1.2, %v526_v47 }
 0x114   :  { %v176_v50 = vadd.f32 -0.1, %v174_v48 }
 0x115   :  { %v175_v51 = vadd.f32 -0.1, %v173_v49 }
 0x116   :  { %v178_v53 = vmax.f32 %v176_v50, 0.0 }
 0x117   :  { %v177_v52 = vmax.f32 %v175_v51, 0.0 }
 0x118   :  { %v180_v55 = vmin.f32 %v178_v53, 1.0 }
 0x119   :  { %v772_v54 = vmin.f32 %v177_v52, 1.0 }
 0x11a   :  { %183 = vst.msk [vmem:[#allocation5 + $0x8] sm:$0xff] %vm181_vm6, %v180_v55 }
 0x11b   :  { %182 = vst.msk [vmem:[#allocation5] sm:$0xff] %vm181_vm6, %v772_v54 }
 0x186   :  { %v270_v56 = vpop.xlane.xlu0 %269 }
 0x187   :  { %v274_v57 = vsub.f32 %v266_v11, %v270_v56 }
 0x189   :  { %v276_v60 = vmul.f32 1.442695, %v274_v57 }
 0x18a   :  { %v273_v58 = vpop.xlane.xlu0 %272 }
 0x18b   :  { %v275_v59 = vsub.f32 %v267_v12, %v273_v58 }
 0x18d   :  { %v278_v61 = vmul.f32 1.442695, %v275_v59 }
 0x18e   :  { %v376_v2 = vpop.permute.xlu0 %375 }
 0x18f   :  { %527 = vpow2.f32 %v278_v61  ;;  %382 = vst.msk [vmem:[#allocation9] sm:$0xff] %vm381_vm8, %v376_v2 }
 0x190   :  { %529 = vpow2.f32 %v276_v60 }
 0x199   :  { %v528_v62 = vpop.eup %527 }
 0x19a   :  { %v283_v63 = vsel %vm181_vm6, %v528_v62, 0.0  ;;  %v530_v0 = vpop.eup %529 }
 0x19b   :  { %284 = vadd.xlane.f32.xlu1 %v283_v63  ;;  %v280_v1 = vsel %vm181_vm6, %v530_v0, 0.0 }
 0x19f   :  { %281 = vadd.xlane.f32.xlu1 %v280_v1 }
 0x1b0   :  { %377 = vrot.lane.b32.xlu1 %v489_v21, %s657_s1 }
 0x1b1   :  { %568 = shalt.err (!%p565_p12)
}
 0x1b2   :  { %s569_s18 = scalar_lea.hbm %s862_s6, 256 }
 0x1b3   :  { %p570_p13 = scmp.ne.s32.totalorder %s862_s6, %s569_s18  ;;  %p573_p0 = scmp.lt.u32.totalorder %s569_s18, %s862_s6 }
 0x1b5   :  { %p575_p1 = pnand %p573_p0, %p570_p13 }
 0x1b7   :  { %578 = shalt.err (!%p575_p1)
}
 0x1b8   :  { %395 = dma.vmem_to_hbm [thread:$0]  %s390_s14, 256, %s862_s6, [#allocation4], %s654_s19, %s654_s19, %s655_s20  }
 0x1b9   :  { %s659_s27 = smov [#allocation9]  }
 0x1ba   :  { %s425_s28 = sshll.u32 %s659_s27, 4  ;;  %s426_s28 = int_to_ptr.vmem [resolvable:$true] %s425_s28 }
 0x1bb   :  { %s579_s2 = scalar_lea.vmem %s426_s28, 256  ;;  %p584_p3 = scmp.lt.s32.totalorder %s426_s28, %s426_s28 }
 0x1bc   :  { %p580_p2 = scmp.ne.s32.totalorder %s426_s28, %s579_s2  ;;  %p585_p4 = scmp.lt.s32.totalorder %s579_s2, %s579_s2 }
 0x1be   :  { %p586_p5 = por %p585_p4, %p584_p3 }
 0x1c0   :  { %p587_p6 = pnand %p586_p5, %p580_p2 }
 0x228   :  { %v285_v3 = vpop.xlane.xlu1 %284 }
 0x229   :  { %531 = vrcp.f32 %v285_v3 }
 0x22c   :  { %v282_v4 = vpop.xlane.xlu1 %281 }
 0x22d   :  { %533 = vrcp.f32 %v282_v4 }
 0x230   :  { %v378_v5 = vpop.permute.xlu1 %377 }
 0x231   :  { %383 = vst.msk [vmem:[#allocation9 + $0x8] sm:$0xff] %vm381_vm8, %v378_v5 }
 0x232   :  { %590 = shalt.err (!%p587_p6)
}
 0x233   :  { %s591_s6 = scalar_lea.hbm %s865_s9, 256 }
 0x234   :  { %p592_p7 = scmp.ne.s32.totalorder %s865_s9, %s591_s6  ;;  %p595_p8 = scmp.lt.u32.totalorder %s591_s6, %s865_s9 }
 0x236   :  { %p597_p9 = pnand %p595_p8, %p592_p7 }
 0x238   :  { %600 = shalt.err (!%p597_p9)
}
 0x239   :  { %431 = dma.vmem_to_hbm [thread:$0]  %s426_s28, 256, %s865_s9, [#allocation10], %s654_s19, %s654_s19, %s655_s20   ;;  %v532_v6 = vpop.eup %531 }
 0x23a   :  { %v289_v7 = vmul.f32 %v532_v6, %v528_v62  ;;  %v534_v9 = vpop.eup %533  ;;  %s660_s3 = smov [#allocation6]   ;;  %s661_s4 = smov [#allocation8]  }
 0x23b   :  { %s401_s5 = sshll.u32 %s660_s3, 4  ;;  %v287_v10 = vmul.f32 %v534_v9, %v530_v0  ;;  %s413_s14 = sshll.u32 %s661_s4, 4  ;;  %s402_s5 = int_to_ptr.vmem [resolvable:$true] %s401_s5  ;;  %s818_s14 = int_to_ptr.vmem [resolvable:$true] %s413_s14 }
 0x23c   :  { %v291_v8 = vmul.f32 %v289_v7, %v180_v55  ;;  %s601_s15 = scalar_lea.vmem %s402_s5, 256  ;;  %p606_p11 = scmp.lt.s32.totalorder %s402_s5, %s402_s5 }
 0x23d   :  { %v290_v11 = vmul.f32 %v287_v10, %v772_v54  ;;  %p602_p10 = scmp.ne.s32.totalorder %s402_s5, %s601_s15  ;;  %p607_p12 = scmp.lt.s32.totalorder %s601_s15, %s601_s15 }
 0x23e   :  { %293 = vst.msk [vmem:[#allocation6 + $0x8] sm:$0xff] %vm181_vm6, %v291_v8 }
 0x23f   :  { %292 = vst.msk [vmem:[#allocation6] sm:$0xff] %vm181_vm6, %v290_v11  ;;  %p608_p13 = por %p607_p12, %p606_p11 }
 0x241   :  { %p609_p0 = pnand %p608_p13, %p602_p10 }
 0x243   :  { %612 = shalt.err (!%p609_p0)
}
 0x244   :  { %s613_s17 = scalar_lea.hbm %s863_s7, 256 }
 0x245   :  { %p614_p1 = scmp.ne.s32.totalorder %s863_s7, %s613_s17  ;;  %p617_p2 = scmp.lt.u32.totalorder %s613_s17, %s863_s7 }
 0x247   :  { %p619_p3 = pnand %p617_p2, %p614_p1 }
 0x249   :  { %622 = shalt.err (!%p619_p3)
}
 0x24a   :  { %407 = dma.vmem_to_hbm [thread:$0]  %s402_s5, 256, %s863_s7, [#allocation7], %s654_s19, %s654_s19, %s655_s20  }
 0x24b   :  { %s623_s26 = scalar_lea.vmem %s818_s14, 256  ;;  %p628_p5 = scmp.lt.s32.totalorder %s818_s14, %s818_s14 }
 0x24c   :  { %p624_p4 = scmp.ne.s32.totalorder %s818_s14, %s623_s26  ;;  %p629_p6 = scmp.lt.s32.totalorder %s623_s26, %s623_s26 }
 0x24e   :  { %p630_p7 = por %p629_p6, %p628_p5 }
 0x250   :  { %p631_p8 = pnand %p630_p7, %p624_p4 }
 0x252   :  { %634 = shalt.err (!%p631_p8)
}
 0x253   :  { %s635_s2 = scalar_lea.hbm %s864_s8, 256 }
 0x254   :  { %p636_p9 = scmp.ne.s32.totalorder %s864_s8, %s635_s2  ;;  %p639_p10 = scmp.lt.u32.totalorder %s635_s2, %s864_s8 }
 0x256   :  { %p641_p11 = pnand %p639_p10, %p636_p9 }
 0x258   :  { %644 = shalt.err (!%p641_p11)
}
 0x259   :  { %419 = dma.vmem_to_hbm [thread:$0]  %s818_s14, 256, %s864_s8, [#allocation7], %s654_s19, %s654_s19, %s655_s20  }
 0x25a   :  { %647 = dma.done.wait [#allocation4], 256  }
 0x25b   :  { %648 = vsyncadd [#allocation4], 4294967040 }
 0x25c   :  { %649 = dma.done.wait [#allocation7], 512  }
 0x25d   :  { %650 = vsyncadd [#allocation7], 4294966784 }
 0x25e   :  { %651 = dma.done.wait [#allocation10], 256  }
 0x25f   :  { %652 = vsyncadd [#allocation10], 4294967040 }
 0x260   :  { %444 = vsyncpa [#allocation3], 1 }
 0x261   :  { %445 = vsyncpa [#allocation4], 1 }
 0x262   :  { %446 = vsyncpa [#allocation7], 1 }
 0x263   :  { %447 = vsyncpa [#allocation10], 1 }

</bundles_post_ra>
